<compile_context>
chip_gen: v5e
topology: v5e:2x2
jax: 0.10.0
libtpu: 0.0.40
codegen_flags: <defaults>
</compile_context>

<pallas_src>
import functools

import jax
import jax.numpy as jnp
from jax import lax
from jax.experimental import pallas as pl
from jax.experimental.pallas import tpu as pltpu


def _tpu_memory_model():
    """Per-generation (vmem_limit_bytes, block_budget_bytes, n_tensorcores).

    block_budget already accounts for the ~4x (2*input + 2*output double-buffer)
    VMEM cost of a fused block, plus headroom for weights / compiler scratch.
    """
    vmem_cap = None
    try:
        vmem_cap = getattr(pltpu.get_tpu_info(), "vmem_capacity_bytes", None)
    except Exception:
        vmem_cap = None
    kind = ""
    try:
        kind = jax.devices()[0].device_kind.lower()
    except Exception:
        kind = ""
    if vmem_cap is None:
        # Conservative (v7x-sized) default unless device_kind says v5/v6 (128 MiB).
        vmem_cap = (128 << 20) if ("v5" in kind or "v6" in kind) else (64 << 20)
    two_tc = ("v7" in kind) or vmem_cap <= (64 << 20)
    n_tc = 2 if two_tc else 1
    if vmem_cap <= (64 << 20):        # v7x: 64 MiB VMEM per TensorCore
        return 48 << 20, 10 << 20, n_tc
    return 96 << 20, 20 << 20, n_tc   # v5e / v6e: 128 MiB VMEM, 1 TensorCore


def _gate_head(s, wselT_ref, w1_ref, w2e_ref, conv_bias, inv_hw):
    """Column-form conv + FC head: (C*T, nb) spatial sums -> (C*T, nb) gates."""
    # y[t, b] = (1/HW) * sum_c conv_w[c] * s[c*T + t, b] + conv_b        -> (T, nb)
    y = jnp.dot(wselT_ref[...], s, preferred_element_type=jnp.float32) * inv_hw
    y = y + conv_bias
    # h = relu(W1 @ y)                                                    -> (T, nb)
    h = jnp.maximum(jnp.dot(w1_ref[...], y, preferred_element_type=jnp.float32), 0.0)
    # gate[c*T + t, b] = sigmoid(W2 @ h)[t, b]  (W2 rows pre-tiled over channels)
    return jax.nn.sigmoid(jnp.dot(w2e_ref[...], h, preferred_element_type=jnp.float32))


def _af3d_fused_kernel(x_ref, wselT_ref, bc_ref, w1_ref, w2e_ref, out_ref, *,
                       inv_hw, nb):
    # x_ref / out_ref: (nb, C*T, HW) -- one or more whole samples per grid step.
    # Per-sample column sums (no f32 copy of x), stacked along lanes -> (C*T, nb)
    # so the gate head runs as ONE batched matmul chain per grid step.
    cols = [jnp.sum(x_ref[b], axis=-1, keepdims=True, dtype=jnp.float32)
            for b in range(nb)]
    s = cols[0] if nb == 1 else jnp.concatenate(cols, axis=1)
    gate = _gate_head(s, wselT_ref, w1_ref, w2e_ref, bc_ref[0], inv_hw)   # (C*T, nb)
    for b in range(nb):                  # small static unroll (nb <= 16)
        out_ref[b] = x_ref[b] * gate[:, b:b + 1].astype(out_ref.dtype)


def _af3d_pool_kernel(x_ref, wselT_ref, bc_ref, w1_ref, w2e_ref, g_ref, acc_ref, *,
                      inv_hw, hw, hw_tile, acc_w):
    # Grid: (sample n, hw tile).  Accumulate a (C*T, acc_w) lane-partial sum with
    # plain VALU adds over 128-lane chunks; the cross-lane reduce + gate matmuls run
    # only once per sample, inside the last-tile finalize (keeps the read-only pass
    # at the HBM roofline instead of XLU / masked-store bound).
    # NOTE: keep the hw axis innermost & "arbitrary" (accumulator correctness).
    hw_i = pl.program_id(1)

    @pl.when(hw_i == 0)
    def _init():
        acc_ref[...] = jnp.zeros_like(acc_ref)

    xb = x_ref[0]                                   # (C*T, hw_tile), input dtype
    ragged = (hw % hw_tile) != 0                    # static: only mask ragged shapes
    part = acc_ref[...]                             # (C*T, acc_w) f32
    for c in range(hw_tile // acc_w):
        chunk = xb[:, c * acc_w:(c + 1) * acc_w].astype(jnp.float32)
        if ragged:
            lane = (lax.broadcasted_iota(jnp.int32, chunk.shape, 1)
                    + hw_i * hw_tile + c * acc_w)
            chunk = jnp.where(lane < hw, chunk, 0.0)   # zero padded lanes out of sum
        part = part + chunk
    acc_ref[...] = part

    @pl.when(hw_i == pl.num_programs(1) - 1)
    def _finalize():
        s = jnp.sum(acc_ref[...], axis=-1, keepdims=True)     # one XLU reduce/sample
        g_ref[0] = _gate_head(s, wselT_ref, w1_ref, w2e_ref, bc_ref[0], inv_hw)


def _af3d_scale_kernel(x_ref, g_ref, out_ref):
    # Pure elementwise: x * gate (per-sublane scalar broadcast along lanes).
    # Partial last HW tiles are handled by Pallas' masked write-back.
    out_ref[0] = x_ref[0] * g_ref[0].astype(out_ref.dtype)


def _pick_sample_block(n, sample_bytes, budget_bytes, n_tc, max_nb=16):
    """Largest per-step sample count within the byte budget.  Only on 2-TC parts
    (v7x) keep >= 2 grid steps so both TensorCores get work; single-TC v5e/v6e take
    the biggest block (fewer 0.35us grid steps, bigger DMAs)."""
    cap = max(1, budget_bytes // max(1, sample_bytes))
    cap = min(cap, max_nb, n)
    if n_tc > 1 and n >= 2:
        cap = min(cap, -(-n // 2))      # ceil(n/2) -> at least 2 grid steps
    return max(1, cap)


def _pick_hw_tile(hw, row_bytes, budget_bytes, max_chunks=32):
    """Lane-dense (multiple-of-128) HW tile within the byte budget.  Non-dividing
    tiles are fine: the grid uses cdiv and padded lanes are masked out of the pool
    sum / dropped on write-back.  max_chunks bounds the in-kernel VALU-add unroll."""
    if hw <= 128:
        return hw
    cap = budget_bytes // max(1, row_bytes)
    cap = max(128, (cap // 128) * 128)
    hw_padded = ((hw + 127) // 128) * 128
    return min(cap, max_chunks * 128, hw_padded)


def af_layer_basic_3d(x, conv_w, conv_b, fc_w1, fc_w2, *,
                      block_budget_bytes=None, vmem_limit_bytes=None):
    """x: (N, C, T, H, W) (PyTorch NCTHW layout); returns the same shape."""
    N, C, T, H, W = x.shape
    HW = H * W
    CT = C * T
    inv_hw = 1.0 / float(HW)
    itemsize = jnp.dtype(x.dtype).itemsize
    sample_bytes = CT * HW * itemsize

    vmem_limit_default, budget_default, n_tc = _tpu_memory_model()
    if vmem_limit_bytes is None:
        vmem_limit_bytes = vmem_limit_default
    if block_budget_bytes is None:
        block_budget_bytes = budget_default

    # Free reshape: collapses adjacent contiguous dims, no transpose / extra HBM pass.
    x3 = x.reshape(N, CT, HW)

    # Tiny constants folding the 1x1x1 conv and the channel-broadcast of the gate:
    #   wselT[t, c*T + t'] = conv_w[c] * (t == t')   (channel reduction as one matmul)
    #   w2e[c*T + t, :]    = fc_w2[t, :]             (gate already expanded over C)
    wc = conv_w.reshape(C).astype(jnp.float32)
    eye_t = jnp.eye(T, dtype=jnp.float32)
    wselT = (eye_t[:, None, :] * wc[None, :, None]).reshape(T, CT)
    w2e = jnp.tile(fc_w2.astype(jnp.float32), (C, 1))            # (C*T, T)
    w1 = fc_w1.astype(jnp.float32)
    bc = conv_b.reshape(1).astype(jnp.float32)                   # scalar -> SMEM

    weight_specs = [
        pl.BlockSpec((T, CT), lambda *_: (0, 0)),                   # wselT
        pl.BlockSpec(memory_space=pltpu.MemorySpace.SMEM),          # conv bias scalar
        pl.BlockSpec((T, T), lambda *_: (0, 0)),                    # fc W1
        pl.BlockSpec((CT, T), lambda *_: (0, 0)),                   # fc W2 (expanded)
    ]

    if sample_bytes <= block_budget_bytes:
        # ---- single pass: 1 read + 1 write of x (HBM roofline floor) ----
        nb = _pick_sample_block(N, sample_bytes, block_budget_bytes, n_tc)
        out3 = pl.pallas_call(
            functools.partial(_af3d_fused_kernel, inv_hw=inv_hw, nb=nb),
            out_shape=jax.ShapeDtypeStruct((N, CT, HW), x.dtype),
            grid_spec=pltpu.PrefetchScalarGridSpec(
                num_scalar_prefetch=0,
                grid=(pl.cdiv(N, nb),),
                in_specs=[pl.BlockSpec((nb, CT, HW), lambda n: (n, 0, 0))]
                + weight_specs,
                out_specs=pl.BlockSpec((nb, CT, HW), lambda n: (n, 0, 0)),
            ),
            compiler_params=pltpu.CompilerParams(
                dimension_semantics=("parallel",),
                vmem_limit_bytes=vmem_limit_bytes,
            ),
        )(x3, wselT, bc, w1, w2e)
    else:
        # ---- two passes: pooled gates, then elementwise scale.  Tile size is
        # decoupled from sample size; costs one extra read of x only when the
        # single-pass version cannot fit VMEM. ----
        hw_tile = _pick_hw_tile(HW, CT * itemsize, block_budget_bytes)
        acc_w = 128 if hw_tile % 128 == 0 else hw_tile
        n_hw = pl.cdiv(HW, hw_tile)

        # TODO(synk): consider pipeline_mode=pl.Buffered(3) on the pool x input so
        # the per-sample finalize (gate matmuls) cannot expose the next DMA on v7x.
        gates = pl.pallas_call(
            functools.partial(_af3d_pool_kernel, inv_hw=inv_hw, hw=HW,
                              hw_tile=hw_tile, acc_w=acc_w),
            out_shape=jax.ShapeDtypeStruct((N, CT, 1), jnp.float32),
            grid_spec=pltpu.PrefetchScalarGridSpec(
                num_scalar_prefetch=0,
                grid=(N, n_hw),
                in_specs=[pl.BlockSpec((1, CT, hw_tile), lambda n, h: (n, 0, h))]
                + weight_specs,
                out_specs=pl.BlockSpec((1, CT, 1), lambda n, h: (n, 0, 0)),
                scratch_shapes=[pltpu.VMEM((CT, acc_w), jnp.float32)],
            ),
            compiler_params=pltpu.CompilerParams(
                dimension_semantics=("parallel", "arbitrary"),
                vmem_limit_bytes=vmem_limit_bytes,
            ),
        )(x3, wselT, bc, w1, w2e)

        out3 = pl.pallas_call(
            _af3d_scale_kernel,
            out_shape=jax.ShapeDtypeStruct((N, CT, HW), x.dtype),
            grid_spec=pltpu.PrefetchScalarGridSpec(
                num_scalar_prefetch=0,
                grid=(N, n_hw),
                in_specs=[
                    pl.BlockSpec((1, CT, hw_tile), lambda n, h: (n, 0, h)),
                    pl.BlockSpec((1, CT, 1), lambda n, h: (n, 0, 0)),
                ],
                out_specs=pl.BlockSpec((1, CT, hw_tile), lambda n, h: (n, 0, h)),
            ),
            compiler_params=pltpu.CompilerParams(
                dimension_semantics=("parallel", "parallel"),
                vmem_limit_bytes=vmem_limit_bytes,
            ),
        )(x3, gates)

    return out3.reshape(N, C, T, H, W)


def reference(x, conv_w, conv_b, fc_w1, fc_w2):
    """Pure-JAX reference matching the PyTorch forward exactly."""
    N, C, T, H, W = x.shape
    conv = jnp.einsum("ncthw,c->nthw", x, conv_w.reshape(C)) + conv_b[0]
    y = jnp.mean(conv, axis=(2, 3))                        # (N, T)
    h = jnp.maximum(y @ fc_w1.T, 0.0)
    g = jax.nn.sigmoid(h @ fc_w2.T)                        # (N, T)
    return x * g[:, None, :, None, None]


if __name__ == "__main__":
    key = jax.random.PRNGKey(0)
    kx, kw, kb, k1, k2, kx2 = jax.random.split(key, 6)

    # Small shapes consistent with the module: segment == T, 1x1x1 conv over C.
    N, C, T, H, W = 2, 4, 4, 16, 16
    x = jax.random.normal(kx, (N, C, T, H, W), dtype=jnp.float32)
    conv_w = jax.random.normal(kw, (1, C, 1, 1, 1), dtype=jnp.float32) * 0.1
    conv_b = jax.random.normal(kb, (1,), dtype=jnp.float32) * 0.1
    fc_w1 = jax.random.normal(k1, (T, T), dtype=jnp.float32) * 0.5
    fc_w2 = jax.random.normal(k2, (T, T), dtype=jnp.float32) * 0.5

    ref = reference(x, conv_w, conv_b, fc_w1, fc_w2)

    # Default path: fused single-pass kernel (native layout, batched gate head).
    out = jax.block_until_ready(af_layer_basic_3d(x, conv_w, conv_b, fc_w1, fc_w2))
    assert out.shape == x.shape
    assert jnp.allclose(out, ref, atol=1e-4, rtol=1e-4), "fused path mismatch"

    # Force the two-pass (pool + scale) path used for large samples / v7x VMEM limits.
    out2 = jax.block_until_ready(
        af_layer_basic_3d(x, conv_w, conv_b, fc_w1, fc_w2,
                          block_budget_bytes=8 * 1024))
    assert jnp.allclose(out2, ref, atol=1e-4, rtol=1e-4), "split path mismatch"

    # Non-128-multiple spatial size (exercises lane masking / ragged tiles).
    Hr = Wr = 12
    xr = jax.random.normal(kx2, (N, C, T, Hr, Wr), dtype=jnp.float32)
    ref_r = reference(xr, conv_w, conv_b, fc_w1, fc_w2)

    out_r = jax.block_until_ready(af_layer_basic_3d(xr, conv_w, conv_b, fc_w1, fc_w2))
    assert jnp.allclose(out_r, ref_r, atol=1e-4, rtol=1e-4), "ragged fused mismatch"

    out_r2 = jax.block_until_ready(
        af_layer_basic_3d(xr, conv_w, conv_b, fc_w1, fc_w2,
                          block_budget_bytes=4 * 1024))
    assert jnp.allclose(out_r2, ref_r, atol=1e-4, rtol=1e-4), "ragged split mismatch"

    print("KERNEL_OK")
</pallas_src>

<mosaic_0001>
module attributes {stable_mosaic.version = 11 : i64} {
  func.func @_af3d_fused_kernel(%arg0: i32, %arg1: memref<1x16x256xf32, #tpu.memory_space<vmem>>, %arg2: memref<4x16xf32, #tpu.memory_space<vmem>>, %arg3: memref<1xf32, #tpu.memory_space<smem>>, %arg4: memref<4x4xf32, #tpu.memory_space<vmem>>, %arg5: memref<16x4xf32, #tpu.memory_space<vmem>>, %arg6: memref<1x16x256xf32, #tpu.memory_space<vmem>>) attributes {dimension_semantics = [#tpu.dimension_semantics<parallel>], iteration_bounds = array<i64: 2>, scalar_prefetch = 0 : i64, scratch_operands = 0 : i64, tpu.core_type = #tpu.core_type<tc>, window_params = [{transform_indices = @transform_0, window_bounds = array<i64: 1, 16, 256>}, {pipeline_mode = #tpu.pipeline_mode<synchronous>, transform_indices = @transform_1, window_bounds = array<i64: 4, 16>}, {transform_indices = @transform_2, window_bounds = array<i64: 1>}, {pipeline_mode = #tpu.pipeline_mode<synchronous>, transform_indices = @transform_3, window_bounds = array<i64: 4, 4>}, {pipeline_mode = #tpu.pipeline_mode<synchronous>, transform_indices = @transform_4, window_bounds = array<i64: 16, 4>}, {transform_indices = @transform_5, window_bounds = array<i64: 1, 16, 256>}]} {
    %c0 = arith.constant 0 : index
    %c0_0 = arith.constant 0 : index
    %c0_1 = arith.constant 0 : index
    %0 = vector.load %arg1[%c0, %c0_0, %c0_1] : memref<1x16x256xf32, #tpu.memory_space<vmem>>, vector<1x16x256xf32>
    %1 = vector.shape_cast %0 : vector<1x16x256xf32> to vector<16x256xf32>
    %cst = arith.constant dense<0.000000e+00> : vector<16xf32>
    %2 = vector.multi_reduction <add>, %1, %cst [1] : vector<16x256xf32> to vector<16xf32>
    %3 = vector.shape_cast %2 : vector<16xf32> to vector<16x1xf32>
    %c0_2 = arith.constant 0 : index
    %4 = memref.load %arg3[%c0_2] : memref<1xf32, #tpu.memory_space<smem>>
    %c0_3 = arith.constant 0 : index
    %c0_4 = arith.constant 0 : index
    %5 = vector.load %arg2[%c0_3, %c0_4] : memref<4x16xf32, #tpu.memory_space<vmem>>, vector<4x16xf32>
    %cst_5 = arith.constant dense<0.000000e+00> : vector<4x1xf32>
    %6 = tpu.matmul %5, %3, %cst_5 {dimension_numbers = #tpu.dot_dimension_numbers<[1], [0], [0], [1], [0, 0, 1, 1], [], []>} : vector<4x16xf32>, vector<16x1xf32>, vector<4x1xf32> -> vector<4x1xf32>
    %cst_6 = arith.constant 3.906250e-03 : f32
    %7 = vector.broadcast %cst_6 : f32 to vector<4x1xf32>
    %8 = arith.mulf %6, %7 : vector<4x1xf32>
    %9 = vector.broadcast %4 : f32 to vector<4x1xf32>
    %10 = arith.addf %8, %9 : vector<4x1xf32>
    %c0_7 = arith.constant 0 : index
    %c0_8 = arith.constant 0 : index
    %11 = vector.load %arg4[%c0_7, %c0_8] : memref<4x4xf32, #tpu.memory_space<vmem>>, vector<4x4xf32>
    %cst_9 = arith.constant dense<0.000000e+00> : vector<4x1xf32>
    %12 = tpu.matmul %11, %10, %cst_9 {dimension_numbers = #tpu.dot_dimension_numbers<[1], [0], [0], [1], [0, 0, 1, 1], [], []>} : vector<4x4xf32>, vector<4x1xf32>, vector<4x1xf32> -> vector<4x1xf32>
    %cst_10 = arith.constant 0.000000e+00 : f32
    %13 = vector.broadcast %cst_10 : f32 to vector<4x1xf32>
    %14 = arith.maximumf %12, %13 : vector<4x1xf32>
    %c0_11 = arith.constant 0 : index
    %c0_12 = arith.constant 0 : index
    %15 = vector.load %arg5[%c0_11, %c0_12] : memref<16x4xf32, #tpu.memory_space<vmem>>, vector<16x4xf32>
    %cst_13 = arith.constant dense<0.000000e+00> : vector<16x1xf32>
    %16 = tpu.matmul %15, %14, %cst_13 {dimension_numbers = #tpu.dot_dimension_numbers<[1], [0], [0], [1], [0, 0, 1, 1], [], []>} : vector<16x4xf32>, vector<4x1xf32>, vector<16x1xf32> -> vector<16x1xf32>
    %17 = arith.negf %16 : vector<16x1xf32>
    %18 = math.exp %17 : vector<16x1xf32>
    %cst_14 = arith.constant 1.000000e+00 : f32
    %19 = vector.broadcast %cst_14 : f32 to vector<16x1xf32>
    %20 = arith.addf %19, %18 : vector<16x1xf32>
    %21 = arith.divf %19, %20 : vector<16x1xf32>
    %c0_15 = arith.constant 0 : index
    %c0_16 = arith.constant 0 : index
    %c0_17 = arith.constant 0 : index
    %22 = vector.load %arg1[%c0_15, %c0_16, %c0_17] : memref<1x16x256xf32, #tpu.memory_space<vmem>>, vector<1x16x256xf32>
    %23 = vector.shape_cast %22 : vector<1x16x256xf32> to vector<16x256xf32>
    %24 = vector.broadcast %21 : vector<16x1xf32> to vector<16x256xf32>
    %25 = arith.mulf %23, %24 : vector<16x256xf32>
    %c0_18 = arith.constant 0 : index
    %c0_19 = arith.constant 0 : index
    %c0_20 = arith.constant 0 : index
    %26 = vector.load %arg6[%c0_18, %c0_19, %c0_20] : memref<1x16x256xf32, #tpu.memory_space<vmem>>, vector<1x16x256xf32>
    %27 = vector.shape_cast %26 : vector<1x16x256xf32> to vector<16x256xf32>
    %28 = vector.shape_cast %25 : vector<16x256xf32> to vector<1x16x256xf32>
    tpu.vector_store %arg6[%c0_18, %c0_19, %c0_20], %28 {strides = array<i32>} : memref<1x16x256xf32, #tpu.memory_space<vmem>>, vector<1x16x256xf32>,
    return
  }
  func.func @transform_0(%arg0: i32) -> (i32, i32, i32) {
    %c0_i32 = arith.constant 0 : i32
    %c0_i32_0 = arith.constant 0 : i32
    %c0_i32_1 = arith.constant 0 : i32
    return %arg0, %c0_i32, %c0_i32_0 : i32, i32, i32
  }
  func.func @transform_1(%arg0: i32) -> (i32, i32) {
    %c0_i32 = arith.constant 0 : i32
    %c0_i32_0 = arith.constant 0 : i32
    %c0_i32_1 = arith.constant 0 : i32
    return %c0_i32, %c0_i32_0 : i32, i32
  }
  func.func @transform_2(%arg0: i32) -> i32 {
    %c0_i32 = arith.constant 0 : i32
    %c0_i32_0 = arith.constant 0 : i32
    return %c0_i32 : i32
  }
  func.func @transform_3(%arg0: i32) -> (i32, i32) {
    %c0_i32 = arith.constant 0 : i32
    %c0_i32_0 = arith.constant 0 : i32
    %c0_i32_1 = arith.constant 0 : i32
    return %c0_i32, %c0_i32_0 : i32, i32
  }
  func.func @transform_4(%arg0: i32) -> (i32, i32) {
    %c0_i32 = arith.constant 0 : i32
    %c0_i32_0 = arith.constant 0 : i32
    %c0_i32_1 = arith.constant 0 : i32
    return %c0_i32, %c0_i32_0 : i32, i32
  }
  func.func @transform_5(%arg0: i32) -> (i32, i32, i32) {
    %c0_i32 = arith.constant 0 : i32
    %c0_i32_0 = arith.constant 0 : i32
    %c0_i32_1 = arith.constant 0 : i32
    return %arg0, %c0_i32, %c0_i32_0 : i32, i32, i32
  }
}

</mosaic_0001>

<bundles_post_ra>
// kernel: tpu_custom_call.1
= control target key start
LH: loop header
LB: loop body
LE: loop exit
PB: predicated region body
PF: predicated region fallthrough
CT: control target
= control target key end

     0   :  { %s875_s0 = inlined_call_operand.hbm [shape: f32[2,16,256], index: 0, kind: input, shape index: {}]   ;;  %s876_s1 = inlined_call_operand.vmem [shape: f32[4,16], index: 1, kind: input, shape index: {}]   ;;  %s877_s2 = inlined_call_operand.<no memory space> [shape: f32[1], index: 2, kind: input, shape index: {}]   ;;  %s878_s3 = inlined_call_operand.vmem [shape: f32[4,4], index: 3, kind: input, shape index: {}]   ;;  %s879_s4 = inlined_call_operand.vmem [shape: f32[16,4], index: 4, kind: input, shape index: {}]   ;;  %s880_s5 = inlined_call_operand.hbm [shape: f32[2,16,256], index: 5, kind: output, shape index: {}]  }
   0x1   :  { %10 = sst [smem:[#allocation2]] %s877_s2 }
   0x2   :  { %11 = vsyncpa [#allocation4], 0 }
   0x3   :  { %13 = vsyncpa [#allocation4 + $0x1], 0 }
   0x4   :  { %14 = vsyncpa [#allocation5], 0 }
   0x5   :  { %16 = vsyncpa [#allocation5 + $0x1], 0  ;;  %s716_s20 = smov 0   ;;  %s718_s21 = smov 0  }
   0x6   :  { %s720_s22 = smov 0   ;;  %s722_s23 = smov 0  }
   0x7 LB: > { %s737_s2 = sadd.s32 4294967295, %s676_s23   ;;  %s494_s24 = sadd.s32 4294967294, %s676_s23   ;;  %s676_s23 = sphi %s722_s23, %s890_s23   ;;  %s672_s22 = sphi %s720_s22, %s889_s22   ;;  %s668_s21 = sphi %s718_s21, %s888_s21   ;;  %s664_s20 = sphi %s716_s20, %s887_s20  }
   0x8   : > { %s741_s25 = sadd.s32 1, %s676_s23   ;;  %s29_s26 = sadd.s32 1, %s672_s22 }
   0x9   : > { %s26_s27 = ssub.s32 %s676_s23, %s741_s25  ;;  %p36_p0 = scmp.ne.s32.totalorder %s672_s22, %s668_s21 }
   0xa   : > { %p27_p1 = scmp.eq.s32.totalorder %s26_s27, 0  ;;  %p37_p2 = scmp.eq.s32.totalorder %s676_s23, 0 }
   0xb   : > { %p42_p3 = scmp.ne.s32.totalorder %s668_s21, %s664_s20  ;;  %p43_p4 = scmp.eq.s32.totalorder %s737_s2, 0 }
   0xc   : > { %s753_s28 = scalar_select %p27_p1, %s672_s22, %s29_s26  }
   0xd   : > { %p755_p5 = por %p37_p2, %p36_p0  ;;  %p759_p6 = por %p43_p4, %p42_p3 }
   0xe   : > { %p150_p7 = scmp.eq.s32.totalorder %s737_s2, 1  ;;  %p156_p8 = scmp.eq.s32.totalorder %s494_s24, 1 }
   0xf   : > { %p531_p10 = scmp.lt.s32.totalorder %s676_s23, 2  ;;  %s188_s8 = sand.u32 1, %s672_s22  }
  0x10   : > { %p766_p11 = por %p150_p7, %p36_p0  ;;  %p770_p12 = por %p156_p8, %p42_p3 }
  0x11   : > { %s516_s9 = sshll.u32 %s676_s23, 5  ;;  %s497_s10 = sshll.u32 %s188_s8, 5 }
  0x12   : > { %s197_s13 = scalar_lea.hbm %s875_s0, %s516_s9  ;;  %s192_s15 = scalar_lea.vmem [#allocation3], %s497_s10 }
  0x13   : > { %s198_s14 = sshll.u32 %s197_s13, 4  ;;  %s200_s16 = sshll.u32 %s192_s15, 4  ;;  %s199_s14 = int_to_ptr.hbm [resolvable:$true] %s198_s14  ;;  %s201_s16 = int_to_ptr.vmem [resolvable:$true] %s200_s16 }
  0x14   : > { %p781_p13 = pnand %p531_p10, %p755_p5  ;;  %p500_p0 = scmp.ge.s32.totalorder %s676_s23, 1 }
  0x15   : > { %p208_p1 = scmp.lt.s32.totalorder %s676_s23, 3  ;;  %s189_s18 = scalar_lea.sflag [#allocation4], %s188_s8 }
  0x16   : > { %s580_s19 = sshra.s32 %s199_s14, 4  ;;  %p584_p3 = pneg %p781_p13  ;;  %s581_s19 = int_to_ptr.hbm [resolvable:$true] %s580_s19 }
  0x17   : > { %s582_s24 = scalar_lea.hbm %s581_s19, 32  ;;  %s587_s29 = scalar_lea.hbm %s875_s0, 64 }
  0x18   : > { %p583_p2 = scmp.ne.s32.totalorder %s581_s19, %s582_s24  ;;  %p588_p5 = scmp.lt.s32.totalorder %s581_s19, %s875_s0 }
  0x19   : > { %p589_p8 = scmp.lt.s32.totalorder %s587_s29, %s582_s24 }
  0x1a   : > { %p585_p4 = pnand %p584_p3, %p583_p2 }
  0x1b   : > { %p590_p10 = por %p589_p8, %p588_p5 }
  0x1c   : > { %p586_p7 = pneg %p585_p4 }
  0x1e   : > { %p591_p9 = pnand %p590_p10, %p586_p7 }
  0x20   : > { %594 = shalt.err (!%p591_p9)
}
  0x21   : > { %s678_s8 = smov 256   ;;  %s679_s11 = smov 16  }
  0x22   : > { %526 = dma.hbm_to_vmem [thread:$0]  (!%p781_p13), %s199_s14, 512, %s201_s16, %s189_s18, %s678_s8, %s678_s8, %s679_s11  }
  0x23   : > { %p209_p2 = pnand %p500_p0, %p208_p1 }
  0x24   : > { %s802_s12 = sand.u32 (!%p209_p2), 1, %s668_s21  }
  0x25   : > { %212 = sbr.rel (%p209_p2) target bundleno = 721 (0x2d1), region = 40  ;;  %s501_s13 = sshll.u32 (!%p209_p2), %s802_s12, 5 }
  0x26   : > { %s215_s15 = scalar_lea.sflag (!%p209_p2), [#allocation4], %s802_s12  ;;  %s218_s19 = scalar_lea.vmem (!%p209_p2), [#allocation3], %s501_s13 }
  0x2a   : > { %655 = dma.done.wait (%p759_p6), %s215_s15, 512  }
  0x2b   : > { %657 = vsyncadd (%p759_p6), %s215_s15, 4294966784  ;;  %v812_v0 = vld [vmem:[%s218_s19 + $0x10] sm:$0xff]  ;;  %v814_v1 = vld [vmem:[%s218_s19 + $0x18] sm:$0xff]  ;;  %vm258_vm0 = vcmask 130048   ;;  %s256_s16 = sld [smem:[#allocation2]]  ;;  %vm290_vm1 = vcmask 1043456  }
  0x2c   : > { %v253_v2 = vadd.f32 %v814_v1, %v812_v0  ;;  %v818_v3 = vld [vmem:[%s218_s19] sm:$0xff]  ;;  %v820_v4 = vld [vmem:[%s218_s19 + $0x8] sm:$0xff]  ;;  %vm286_vm2 = vcmask 31744   ;;  %v680_v18 = vmov 0   ;;  %s517_s9 = sshll.u32 %s737_s2, 5  ;;  %s245_s10 = scalar_lea.vmem [#allocation6], %s501_s13 }
  0x2d   : > { %v250_v5 = vadd.f32 %v820_v4, %v818_v3  ;;  %v257_v7 = vld [vmem:[%s876_s1] sm:$0xf]  ;;  %v316_v17 = vld [vmem:[%s879_s4 + $0x8] sm:$0xff]  ;;  %570 = vset.pattern.permute.xlu1 %v680_v18  ;;  %571 = vset.pattern.permute.xlu0 %v680_v18  ;;  %s417_s15 = scalar_lea.hbm %s880_s5, %s517_s9  ;;  %s418_s19 = sshll.u32 %s245_s10, 4  ;;  %s419_s19 = int_to_ptr.vmem [resolvable:$true] %s418_s19 }
  0x2e   : > { %254 = vadd.xlane.f32.xlu0 %v253_v2  ;;  %v285_v13 = vld [vmem:[%s878_s3] sm:$0xf]  ;;  %s420_s30 = sshll.u32 %s417_s15, 4  ;;  %s406_s2 = scalar_lea.sflag [#allocation5], %s802_s12  ;;  %s421_s30 = int_to_ptr.hbm [resolvable:$true] %s420_s30 }
  0x2f   : > { %v315_v16 = vld [vmem:[%s879_s4] sm:$0xff]  ;;  %s624_s13 = sshra.s32 %s421_s30, 4  ;;  %s630_s18 = scalar_lea.hbm %s880_s5, 64  ;;  %s625_s13 = int_to_ptr.hbm [resolvable:$true] %s624_s13 }
  0x30   : > { %s626_s14 = scalar_lea.hbm %s625_s13, 32  ;;  %p631_p0 = scmp.lt.s32.totalorder %s625_s13, %s880_s5 }
  0x31   : > { %v283_v10 = vstv %s256_s16  ;;  %p627_p6 = scmp.ne.s32.totalorder %s625_s13, %s626_s14  ;;  %p632_p1 = scmp.lt.s32.totalorder %s630_s18, %s626_s14 }
  0x33   : > { %p628_p9 = pnand %p627_p6, %p766_p11  ;;  %p633_p3 = por %p632_p1, %p631_p0 }
  0x35   : > { %p629_p13 = pneg %p628_p9 }
  0x36   : > { %251 = vadd.xlane.f32.xlu0 %v250_v5 }
  0x37   : > { %p634_p4 = pnand %p633_p3, %p629_p13 }
  0xa1   : > { %v255_v6 = vpop.xlane.xlu0 %254 }
  0xa2   : > { %276 = vmatpush.msra.mxu0 %v255_v6 }
  0xa9   : > { %v252_v8 = vpop.xlane.xlu0 %251 }
  0xaa   : > { %277 = vmatpush.msra.mxu0 %v252_v8 }
  0xab   : > { %503 = vmatmul.msk.f32.vlgmr.msra.gmra.mxu0 %vm258_vm0, %v257_v7 }
 0x128   : > { %v279_v9 = vpop.f32.mrf.mxu0 }
 0x129   : > { %v282_v11 = vmul.f32 0.00390625, %v279_v9 }
 0x12b   : > { %v284_v12 = vadd.f32 %v283_v10, %v282_v11 }
 0x12d   : > { %504 = vmatpush.msk.msra.mxu1 %vm290_vm1, %v284_v12 }
 0x12e   : > { %505 = vmatmul.msk.f32.vlgmr.msra.gmra.mxu1 %vm286_vm2, %v285_v13 }
 0x1ab   : > { %v311_v14 = vpop.f32.mrf.mxu1 }
 0x1ac   : > { %v314_v15 = vmax.f32 %v311_v14, 0.0 }
 0x1ae   : > { %506 = vmatpush.msk.msra.mxu2 %vm290_vm1, %v314_v15  ;;  %518 = vmatpush.msk.msra.mxu3 %vm290_vm1, %v314_v15 }
 0x1af   : > { %507 = vmatmul.msk.f32.vlgmr.msra.gmra.mxu2 %vm286_vm2, %v315_v16  ;;  %508 = vmatmul.msk.f32.vlgmr.msra.gmra.mxu3 %vm286_vm2, %v316_v17 }
 0x232   : > { %v343_v19 = vpop.f32.mrf.mxu2  ;;  %v346_v20 = vpop.f32.mrf.mxu3 }
 0x233   : > { %v509_v21 = vmul.f32 -1.442695, %v343_v19  ;;  %v510_v22 = vmul.f32 -1.442695, %v346_v20 }
 0x235   : > { %572 = vpow2.f32 %v509_v21 }
 0x236   : > { %574 = vpow2.f32 %v510_v22 }
 0x23b   : > { %v573_v23 = vpop.eup %572 }
 0x23c   : > { %v575_v24 = vpop.eup %574  ;;  %v355_v25 = vadd.f32 1.0, %v573_v23 }
 0x23d   : > { %v356_v26 = vadd.f32 1.0, %v575_v24 }
 0x23e   : > { %576 = vrcp.f32 %v355_v25  ;;  %v368_v32 = vand.u32 2147483648, %v355_v25  ;;  %v366_v35 = vand.u32 2147483647, %v355_v25  ;;  %vm362_vm4 = vweird.f32 %v355_v25 }
 0x23f   : > { %578 = vrcp.f32 %v356_v26  ;;  %vm377_vm7 = vweird.f32 %v356_v26  ;;  %v383_v42 = vand.u32 2147483648, %v356_v26  ;;  %v381_v43 = vand.u32 2147483647, %v356_v26 }
 0x240   : > { %v369_v38 = vor.u32 1.1754944e-38, %v368_v32  ;;  %vm367_vm6 = vcmp.eq.f32.partialorder %v366_v35, 8.507059e+37 }
 0x241   : > { %v384_v45 = vor.u32 1.1754944e-38, %v383_v42  ;;  %vm382_vm10 = vcmp.eq.f32.partialorder %v381_v43, 8.507059e+37 }
 0x244   : > { %v577_v27 = vpop.eup %576 }
 0x245   : > { %v579_v28 = vpop.eup %578  ;;  %v358_v29 = vmul.f32 %v577_v27, %v355_v25  ;;  %vm363_vm3 = vweird.f32 %v577_v27 }
 0x246   : > { %v373_v30 = vmul.f32 %v579_v28, %v356_v26  ;;  %vm364_vm5 = vmor %vm362_vm4, %vm363_vm3  ;;  %vm378_vm8 = vweird.f32 %v579_v28 }
 0x247   : > { %v359_v31 = vsub.f32 1.0, %v358_v29  ;;  %vm379_vm9 = vmor %vm377_vm7, %vm378_vm8 }
 0x248   : > { %v374_v33 = vsub.f32 1.0, %v373_v30 }
 0x249   : > { %v360_v34 = vmul.f32 %v577_v27, %v359_v31 }
 0x24a   : > { %v375_v37 = vmul.f32 %v579_v28, %v374_v33 }
 0x24b   : > { %v361_v36 = vadd.f32 %v577_v27, %v360_v34 }
 0x24c   : > { %v376_v41 = vadd.f32 %v579_v28, %v375_v37 }
 0x24d   : > { %v365_v39 = vsel %vm364_vm5, %v577_v27, %v361_v36 }
 0x24e   : > { %v370_v40 = vsel %vm367_vm6, %v369_v38, %v365_v39  ;;  %v380_v44 = vsel %vm379_vm9, %v579_v28, %v376_v41 }
 0x24f   : > { %389 = vperm.xlu1 %570, %v370_v40   ;;  %v385_v46 = vsel %vm382_vm10, %v384_v45, %v380_v44 }
 0x257   : > { %394 = vperm.xlu1 %570, %v385_v46  }
 0x2c1   : > { %v390_v47 = vpop.permute.xlu1 %389 }
 0x2c2   : > { %v397_v48 = vmul.f32 %v390_v47, %v818_v3  ;;  %v398_v49 = vmul.f32 %v390_v47, %v820_v4 }
 0x2c4   : > { %401 = vst [vmem:[%s245_s10] sm:$0xff] %v397_v48 }
 0x2c5   : > { %402 = vst [vmem:[%s245_s10 + $0x8] sm:$0xff] %v398_v49 }
 0x2c9   : > { %v395_v50 = vpop.permute.xlu1 %394 }
 0x2ca   : > { %v399_v51 = vmul.f32 %v395_v50, %v812_v0  ;;  %v400_v52 = vmul.f32 %v395_v50, %v814_v1 }
 0x2cc   : > { %403 = vst [vmem:[%s245_s10 + $0x10] sm:$0xff] %v399_v51 }
 0x2cd   : > { %404 = vst [vmem:[%s245_s10 + $0x18] sm:$0xff] %v400_v52 }
 0x2ce   : > { %637 = shalt.err (!%p634_p4)
}
 0x2cf   : > { %s681_s12 = smov 256   ;;  %s682_s27 = smov 16  }
 0x2d0   : > { %521 = dma.vmem_to_hbm [thread:$0]  (%p766_p11), %s419_s19, 512, %s421_s30, %s406_s2, %s681_s12, %s681_s12, %s682_s27  }
 0x2d1 PF: > { %s435_s29 = sand.u32 1, %s664_s20   ;;  %p886_p7 = scmp.ge.s32.totalorder %s676_s23, 2 }
 0x2d2   : > { %s436_s9 = scalar_lea.sflag [#allocation5], %s435_s29 }
 0x2d3   : > { %p528_p5 = pnand %p886_p7, %p770_p12 }
 0x2d5   : > { %p529_p8 = pneg %p528_p5 }
 0x2d7   : > { %659 = dma.done.wait (%p529_p8), %s436_s9, 512  }
 0x2d8   : > { %661 = vsyncadd (%p529_p8), %s436_s9, 4294966784  ;;  %p19_p10 = scmp.ge.s32.totalorder %s741_s25, 4   ;;  %s887_s20 = smov %s668_s21 }
 0x2d9   : > { %s888_s21 = smov %s672_s22  ;;  %s889_s22 = smov %s753_s28 }
 0x2da   : > { %s890_s23 = smov %s741_s25  ;;  %21 = sbr.rel (!%p19_p10) target bundleno = 7 (0x7), region = 85 }
 0x2df   :  { %442 = vsyncpa [#allocation4], 1 }
 0x2e0   :  { %444 = vsyncpa [#allocation4 + $0x1], 1 }
 0x2e1   :  { %445 = vsyncpa [#allocation5], 1 }
 0x2e2   :  { %447 = vsyncpa [#allocation5 + $0x1], 1 }

</bundles_post_ra>
